<compile_context>
chip_gen: v5e
topology: v5e:2x2
jax: 0.10.0
libtpu: 0.0.40
codegen_flags: <defaults>
</compile_context>

<pallas_src>
import jax
import jax.numpy as jnp
from jax import lax
from jax.experimental import pallas as pl
from jax.experimental.pallas import tpu as pltpu


def _round_up(n, m):
    return pl.cdiv(n, m) * m


def _mlp_kernel(x_ref, w_ref, b_ref, o_ref):
    # x_ref: (TB, 5)     batch-major f32 input tile (native layout, pipelined)
    # w_ref: (4, 16, 16) packed / zero-padded bf16 weight slab (VMEM-resident)
    # b_ref: (4, 16, 1)  packed / zero-padded f32 bias slab    (VMEM-resident)
    # o_ref: (1, TB)     lane-dense sigmoid output (f32)
    x = x_ref[...].astype(jnp.bfloat16)                # (TB, 5)

    w1 = w_ref[0][:, 0:5]                              # (16, 5)  bf16
    w2 = w_ref[1]                                      # (16, 16) bf16
    w3 = w_ref[2][0:8, :]                              # (8, 16)  bf16
    w4 = w_ref[3][0:8, 0:1].astype(jnp.float32)        # (8, 1)   f32 column
    b1 = b_ref[0]                                      # (16, 1)
    b2 = b_ref[1]                                      # (16, 1)
    b3 = b_ref[2][0:8]                                 # (8, 1)
    b4 = b_ref[3][0:1]                                 # (1, 1)

    # Layer 1: NT contraction (W1 axis 1 vs x axis 1) -> feature-major
    # (16, TB) result; bf16 operands, f32 accumulation, single MXU pass.
    h = lax.dot_general(w1, x, (((1,), (1,)), ((), ())),
                        preferred_element_type=jnp.float32)         # (16, TB)
    h = jnp.maximum(h + b1, 0.0).astype(jnp.bfloat16)

    h = jnp.dot(w2, h, preferred_element_type=jnp.float32)          # (16, TB)
    h = jnp.maximum(h + b2, 0.0).astype(jnp.bfloat16)

    h = jnp.dot(w3, h, preferred_element_type=jnp.float32)          # (8, TB)
    h = jnp.maximum(h + b3, 0.0)                                    # f32

    # Linear(8 -> 1): VPU broadcast-FMA + sublane (XLU) reduction; keeps the
    # tiny GEMV off the MXU and yields a lane-dense (1, TB) row.
    logits = jnp.sum(w4 * h, axis=0, keepdims=True) + b4            # (1, TB)
    o_ref[...] = jax.nn.sigmoid(logits)


def pack_params(params):
    """Pack the 4 layers into one bf16 weight slab + one f32 bias slab.

    Layers 1..3 keep the PyTorch (out, in) orientation; layer 4 is stored as
    a column so the kernel can use a VPU/XLU reduction for the final GEMV.
    """
    w_slab = jnp.zeros((4, 16, 16), jnp.float32)
    b_slab = jnp.zeros((4, 16, 1), jnp.float32)
    w_slab = w_slab.at[0, :16, :5].set(params["w1"])
    w_slab = w_slab.at[1, :16, :16].set(params["w2"])
    w_slab = w_slab.at[2, :8, :16].set(params["w3"])
    w_slab = w_slab.at[3, :8, 0].set(params["w4"][0, :])
    b_slab = b_slab.at[0, :16, 0].set(params["b1"])
    b_slab = b_slab.at[1, :16, 0].set(params["b2"])
    b_slab = b_slab.at[2, :8, 0].set(params["b3"])
    b_slab = b_slab.at[3, :1, 0].set(params["b4"])
    return w_slab.astype(jnp.bfloat16), b_slab


def code_complexity_forward(x, params, *, block_b=16384, min_steps=8):
    """x: (B, 5) float; params: PyTorch-convention weights (out,in), biases (out,)."""
    if block_b % 128 != 0:
        raise ValueError("block_b must be a multiple of 128")
    B = x.shape[0]
    x = x.astype(jnp.float32)

    # Batch tile: multiple of 128 lanes.  Big tiles amortize the ~0.35 us
    # per-grid-step overhead; keeping >= min_steps steps lets the "parallel"
    # batch axis shard across v7x's two TensorCores.  The batch-major (TB,5)
    # f32 block lane-pads to (TB,128) in VMEM (~512*TB B per pipeline buffer),
    # so TB is capped at block_b (16K -> ~22 MiB total incl. activations),
    # well inside v7x's 64 MiB VMEM; vmem_limit_bytes raised explicitly.
    TB = max(128, min(block_b, _round_up(pl.cdiv(max(B, 1), min_steps), 128)))
    grid_b = pl.cdiv(max(B, 1), TB)
    Bp = grid_b * TB          # padded output width -> always-unmasked stores

    w_slab, b_slab = pack_params(params)

    out = pl.pallas_call(
        _mlp_kernel,
        out_shape=jax.ShapeDtypeStruct((1, Bp), jnp.float32),
        grid=(grid_b,),
        in_specs=[
            pl.BlockSpec((TB, 5), lambda i: (i, 0)),           # x tile, native layout
            pl.BlockSpec((4, 16, 16), lambda i: (0, 0, 0)),    # weight slab (resident)
            pl.BlockSpec((4, 16, 1), lambda i: (0, 0, 0)),     # bias slab (resident)
        ],
        out_specs=pl.BlockSpec((1, TB), lambda i: (0, i)),     # lane-dense output
        compiler_params=pltpu.CompilerParams(
            dimension_semantics=("parallel",),                 # megacore on v7x
            vmem_limit_bytes=48 * 1024 * 1024),
        cost_estimate=pl.CostEstimate(
            flops=944 * B, bytes_accessed=24 * B, transcendentals=B),
    )(x, w_slab, b_slab)

    # Back to the PyTorch-compatible (B, 1) shape; garbage columns from the
    # ragged last input tile are sliced off here.
    return out[0, :B].reshape(B, 1)


def init_params(key):
    """nn.Linear-style uniform(-1/sqrt(in), 1/sqrt(in)); W is (out, in)."""
    dims = [(5, 16), (16, 16), (16, 8), (8, 1)]
    params = {}
    keys = jax.random.split(key, 2 * len(dims))
    for i, (fan_in, fan_out) in enumerate(dims):
        bound = 1.0 / float(fan_in) ** 0.5
        params[f"w{i + 1}"] = jax.random.uniform(
            keys[2 * i], (fan_out, fan_in), minval=-bound, maxval=bound,
            dtype=jnp.float32)
        params[f"b{i + 1}"] = jax.random.uniform(
            keys[2 * i + 1], (fan_out,), minval=-bound, maxval=bound,
            dtype=jnp.float32)
    return params


def reference_forward(x, params):
    h = jnp.maximum(x @ params["w1"].T + params["b1"], 0.0)
    h = jnp.maximum(h @ params["w2"].T + params["b2"], 0.0)
    h = jnp.maximum(h @ params["w3"].T + params["b3"], 0.0)
    return jax.nn.sigmoid(h @ params["w4"].T + params["b4"])


if __name__ == "__main__":
    key = jax.random.PRNGKey(0)
    k_x, k_p, k_x2 = jax.random.split(key, 3)
    params = init_params(k_p)

    # Small PyTorch-shaped input: (batch, 5).
    x = jax.random.normal(k_x, (8, 5), dtype=jnp.float32)
    out = jax.block_until_ready(code_complexity_forward(x, params))
    ref = reference_forward(x, params)
    assert out.shape == (8, 1)
    # bf16 matmul operands (f32 accumulation) -> relaxed tolerance vs f32 ref.
    assert jnp.allclose(out, ref, atol=2e-2, rtol=0.0)
    assert bool(jnp.all((out >= 0.0) & (out <= 1.0)))

    # Exercise the multi-tile grid and ragged-batch (partial last block) path.
    x2 = jax.random.normal(k_x2, (300, 5), dtype=jnp.float32)
    out2 = jax.block_until_ready(
        code_complexity_forward(x2, params, block_b=128))
    ref2 = reference_forward(x2, params)
    assert out2.shape == (300, 1)
    assert jnp.allclose(out2, ref2, atol=2e-2, rtol=0.0)

    print("KERNEL_OK")
</pallas_src>

<mosaic_0001>
module attributes {stable_mosaic.version = 11 : i64} {
  func.func @_mlp_kernel(%arg0: i32, %arg1: memref<128x5xf32, #tpu.memory_space<vmem>>, %arg2: memref<4x16x16xbf16, #tpu.memory_space<vmem>>, %arg3: memref<4x16x1xf32, #tpu.memory_space<vmem>>, %arg4: memref<1x128xf32, #tpu.memory_space<vmem>>) attributes {dimension_semantics = [#tpu.dimension_semantics<parallel>], iteration_bounds = array<i64: 1>, scalar_prefetch = 0 : i64, scratch_operands = 0 : i64, tpu.core_type = #tpu.core_type<tc>, window_params = [{transform_indices = @transform_0, window_bounds = array<i64: 128, 5>}, {pipeline_mode = #tpu.pipeline_mode<synchronous>, transform_indices = @transform_1, window_bounds = array<i64: 4, 16, 16>}, {pipeline_mode = #tpu.pipeline_mode<synchronous>, transform_indices = @transform_2, window_bounds = array<i64: 4, 16, 1>}, {transform_indices = @transform_3, window_bounds = array<i64: 1, 128>}]} {
    %c0 = arith.constant 0 : index
    %c0_0 = arith.constant 0 : index
    %0 = vector.load %arg1[%c0, %c0_0] : memref<128x5xf32, #tpu.memory_space<vmem>>, vector<128x5xf32>
    %1 = arith.truncf %0 : vector<128x5xf32> to vector<128x5xbf16>
    %c0_1 = arith.constant 0 : index
    %c0_2 = arith.constant 0 : index
    %c0_3 = arith.constant 0 : index
    %2 = vector.load %arg2[%c0_1, %c0_2, %c0_3] : memref<4x16x16xbf16, #tpu.memory_space<vmem>>, vector<1x16x16xbf16>
    %3 = vector.shape_cast %2 : vector<1x16x16xbf16> to vector<16x16xbf16>
    %4 = vector.extract_strided_slice %3 {offsets = [0, 0], sizes = [16, 5], strides = [1, 1]} : vector<16x16xbf16> to vector<16x5xbf16>
    %c1 = arith.constant 1 : index
    %c0_4 = arith.constant 0 : index
    %c0_5 = arith.constant 0 : index
    %5 = vector.load %arg2[%c1, %c0_4, %c0_5] : memref<4x16x16xbf16, #tpu.memory_space<vmem>>, vector<1x16x16xbf16>
    %6 = vector.shape_cast %5 : vector<1x16x16xbf16> to vector<16x16xbf16>
    %c2 = arith.constant 2 : index
    %c0_6 = arith.constant 0 : index
    %c0_7 = arith.constant 0 : index
    %7 = vector.load %arg2[%c2, %c0_6, %c0_7] : memref<4x16x16xbf16, #tpu.memory_space<vmem>>, vector<1x16x16xbf16>
    %8 = vector.shape_cast %7 : vector<1x16x16xbf16> to vector<16x16xbf16>
    %9 = vector.extract_strided_slice %8 {offsets = [0, 0], sizes = [8, 16], strides = [1, 1]} : vector<16x16xbf16> to vector<8x16xbf16>
    %c3 = arith.constant 3 : index
    %c0_8 = arith.constant 0 : index
    %c0_9 = arith.constant 0 : index
    %10 = vector.load %arg2[%c3, %c0_8, %c0_9] : memref<4x16x16xbf16, #tpu.memory_space<vmem>>, vector<1x16x16xbf16>
    %11 = vector.shape_cast %10 : vector<1x16x16xbf16> to vector<16x16xbf16>
    %12 = vector.extract_strided_slice %11 {offsets = [0, 0], sizes = [8, 1], strides = [1, 1]} : vector<16x16xbf16> to vector<8x1xbf16>
    %13 = arith.extf %12 : vector<8x1xbf16> to vector<8x1xf32>
    %c0_10 = arith.constant 0 : index
    %c0_11 = arith.constant 0 : index
    %c0_12 = arith.constant 0 : index
    %14 = vector.load %arg3[%c0_10, %c0_11, %c0_12] : memref<4x16x1xf32, #tpu.memory_space<vmem>>, vector<1x16x1xf32>
    %15 = vector.shape_cast %14 : vector<1x16x1xf32> to vector<16x1xf32>
    %c1_13 = arith.constant 1 : index
    %c0_14 = arith.constant 0 : index
    %c0_15 = arith.constant 0 : index
    %16 = vector.load %arg3[%c1_13, %c0_14, %c0_15] : memref<4x16x1xf32, #tpu.memory_space<vmem>>, vector<1x16x1xf32>
    %17 = vector.shape_cast %16 : vector<1x16x1xf32> to vector<16x1xf32>
    %c2_16 = arith.constant 2 : index
    %c0_17 = arith.constant 0 : index
    %c0_18 = arith.constant 0 : index
    %18 = vector.load %arg3[%c2_16, %c0_17, %c0_18] : memref<4x16x1xf32, #tpu.memory_space<vmem>>, vector<1x16x1xf32>
    %19 = vector.shape_cast %18 : vector<1x16x1xf32> to vector<16x1xf32>
    %20 = vector.extract_strided_slice %19 {offsets = [0, 0], sizes = [8, 1], strides = [1, 1]} : vector<16x1xf32> to vector<8x1xf32>
    %c3_19 = arith.constant 3 : index
    %c0_20 = arith.constant 0 : index
    %c0_21 = arith.constant 0 : index
    %21 = vector.load %arg3[%c3_19, %c0_20, %c0_21] : memref<4x16x1xf32, #tpu.memory_space<vmem>>, vector<1x16x1xf32>
    %22 = vector.shape_cast %21 : vector<1x16x1xf32> to vector<16x1xf32>
    %23 = vector.extract_strided_slice %22 {offsets = [0, 0], sizes = [1, 1], strides = [1, 1]} : vector<16x1xf32> to vector<1x1xf32>
    %cst = arith.constant dense<0.000000e+00> : vector<16x128xf32>
    %24 = tpu.matmul %4, %1, %cst {dimension_numbers = #tpu.dot_dimension_numbers<[1], [1], [0], [0], [0, 0, 1, 0], [], []>} : vector<16x5xbf16>, vector<128x5xbf16>, vector<16x128xf32> -> vector<16x128xf32>
    %25 = vector.broadcast %15 : vector<16x1xf32> to vector<16x128xf32>
    %26 = arith.addf %24, %25 : vector<16x128xf32>
    %cst_22 = arith.constant 0.000000e+00 : f32
    %27 = vector.broadcast %cst_22 : f32 to vector<16x128xf32>
    %28 = arith.maximumf %26, %27 : vector<16x128xf32>
    %29 = arith.truncf %28 : vector<16x128xf32> to vector<16x128xbf16>
    %cst_23 = arith.constant dense<0.000000e+00> : vector<16x128xf32>
    %30 = tpu.matmul %6, %29, %cst_23 {dimension_numbers = #tpu.dot_dimension_numbers<[1], [0], [0], [1], [0, 0, 1, 1], [], []>} : vector<16x16xbf16>, vector<16x128xbf16>, vector<16x128xf32> -> vector<16x128xf32>
    %31 = vector.broadcast %17 : vector<16x1xf32> to vector<16x128xf32>
    %32 = arith.addf %30, %31 : vector<16x128xf32>
    %cst_24 = arith.constant 0.000000e+00 : f32
    %33 = vector.broadcast %cst_24 : f32 to vector<16x128xf32>
    %34 = arith.maximumf %32, %33 : vector<16x128xf32>
    %35 = arith.truncf %34 : vector<16x128xf32> to vector<16x128xbf16>
    %cst_25 = arith.constant dense<0.000000e+00> : vector<8x128xf32>
    %36 = tpu.matmul %9, %35, %cst_25 {dimension_numbers = #tpu.dot_dimension_numbers<[1], [0], [0], [1], [0, 0, 1, 1], [], []>} : vector<8x16xbf16>, vector<16x128xbf16>, vector<8x128xf32> -> vector<8x128xf32>
    %37 = vector.broadcast %20 : vector<8x1xf32> to vector<8x128xf32>
    %38 = arith.addf %36, %37 : vector<8x128xf32>
    %cst_26 = arith.constant 0.000000e+00 : f32
    %39 = vector.broadcast %cst_26 : f32 to vector<8x128xf32>
    %40 = arith.maximumf %38, %39 : vector<8x128xf32>
    %41 = vector.broadcast %13 : vector<8x1xf32> to vector<8x128xf32>
    %42 = arith.mulf %41, %40 : vector<8x128xf32>
    %cst_27 = arith.constant dense<0.000000e+00> : vector<128xf32>
    %43 = vector.multi_reduction <add>, %42, %cst_27 [0] : vector<8x128xf32> to vector<128xf32>
    %44 = vector.shape_cast %43 : vector<128xf32> to vector<1x128xf32>
    %45 = vector.broadcast %23 : vector<1x1xf32> to vector<1x128xf32>
    %46 = arith.addf %44, %45 : vector<1x128xf32>
    %47 = arith.negf %46 : vector<1x128xf32>
    %48 = math.exp %47 : vector<1x128xf32>
    %cst_28 = arith.constant 1.000000e+00 : f32
    %49 = vector.broadcast %cst_28 : f32 to vector<1x128xf32>
    %50 = arith.addf %49, %48 : vector<1x128xf32>
    %51 = arith.divf %49, %50 : vector<1x128xf32>
    %c0_29 = arith.constant 0 : index
    %c0_30 = arith.constant 0 : index
    %52 = vector.load %arg4[%c0_29, %c0_30] : memref<1x128xf32, #tpu.memory_space<vmem>>, vector<1x128xf32>
    tpu.vector_store %arg4[%c0_29, %c0_30], %51 {strides = array<i32>} : memref<1x128xf32, #tpu.memory_space<vmem>>, vector<1x128xf32>,
    return
  }
  func.func @transform_0(%arg0: i32) -> (i32, i32) {
    %c0_i32 = arith.constant 0 : i32
    %c0_i32_0 = arith.constant 0 : i32
    return %arg0, %c0_i32 : i32, i32
  }
  func.func @transform_1(%arg0: i32) -> (i32, i32, i32) {
    %c0_i32 = arith.constant 0 : i32
    %c0_i32_0 = arith.constant 0 : i32
    %c0_i32_1 = arith.constant 0 : i32
    %c0_i32_2 = arith.constant 0 : i32
    return %c0_i32, %c0_i32_0, %c0_i32_1 : i32, i32, i32
  }
  func.func @transform_2(%arg0: i32) -> (i32, i32, i32) {
    %c0_i32 = arith.constant 0 : i32
    %c0_i32_0 = arith.constant 0 : i32
    %c0_i32_1 = arith.constant 0 : i32
    %c0_i32_2 = arith.constant 0 : i32
    return %c0_i32, %c0_i32_0, %c0_i32_1 : i32, i32, i32
  }
  func.func @transform_3(%arg0: i32) -> (i32, i32) {
    %c0_i32 = arith.constant 0 : i32
    %c0_i32_0 = arith.constant 0 : i32
    return %c0_i32, %arg0 : i32, i32
  }
}

</mosaic_0001>

<bundles_post_ra>
// kernel: tpu_custom_call.1
= control target key start
LH: loop header
LB: loop body
LE: loop exit
PB: predicated region body
PF: predicated region fallthrough
CT: control target
= control target key end

     0   :  { %vm74_vm0 = vcmask 39936   ;;  %s402_s0 = inlined_call_operand.vmem [shape: f32[8,5], index: 0, kind: input, shape index: {}]   ;;  %s403_s1 = inlined_call_operand.vmem [shape: bf16[4,16,16], index: 1, kind: input, shape index: {}]   ;;  %s404_s2 = inlined_call_operand.vmem [shape: f32[4,16,1], index: 2, kind: input, shape index: {}]   ;;  %s405_s3 = inlined_call_operand.hbm [shape: f32[1,128], index: 3, kind: output, shape index: {}]  }
   0x1   :  { %v30_v0 = vld [vmem:[%s402_s0 + $0x70] sm:$0xff]  ;;  %v31_v1 = vld [vmem:[%s402_s0 + $0x78] sm:$0xff]  ;;  %v28_v3 = vld [vmem:[%s402_s0 + $0x60] sm:$0xff] }
   0x2   :  { %v39_v2 = vpack.c.bf16 %v31_v1, %v30_v0  ;;  %v29_v4 = vld [vmem:[%s402_s0 + $0x68] sm:$0xff] }
   0x4   :  { %v100_v5 = vsel %vm74_vm0, %v39_v2, 0 }
   0x5   :  { %8 = vsyncpa [#allocation3], 0  ;;  %102 = vmatpush.bf16.xpose.msra.mxu0 %v100_v5  ;;  %v38_v6 = vpack.c.bf16 %v29_v4, %v28_v3  ;;  %v26_v8 = vld [vmem:[%s402_s0 + $0x50] sm:$0xff]  ;;  %v27_v9 = vld [vmem:[%s402_s0 + $0x58] sm:$0xff]  ;;  %v288_v20 = vmov 0   ;;  %vm134_vm1 = vcmask 130048  }
   0x6   :  { %v37_v10 = vpack.c.bf16 %v27_v9, %v26_v8  ;;  %v24_v12 = vld [vmem:[%s402_s0 + $0x40] sm:$0xff]  ;;  %v25_v13 = vld [vmem:[%s402_s0 + $0x48] sm:$0xff]  ;;  %v22_v16 = vld [vmem:[%s402_s0 + $0x30] sm:$0xff]  ;;  %255 = vset.pattern.permute.xlu0 %v288_v20  ;;  %256 = vset.pattern.permute.xlu1 %v288_v20  ;;  %s222_s11 = sshll.u32 %s405_s3, 4  ;;  %s223_s11 = int_to_ptr.hbm [resolvable:$true] %s222_s11 }
   0x7   :  { %v97_v7 = vsel %vm74_vm0, %v38_v6, 0  ;;  %v36_v14 = vpack.c.bf16 %v25_v13, %v24_v12  ;;  %v23_v17 = vld [vmem:[%s402_s0 + $0x38] sm:$0xff]  ;;  %v50_v18 = vld [vmem:[%s404_s2] sm:$0xff]  ;;  %257 = vset.pattern.permute.xlu2 %v288_v20  ;;  %v21_v23 = vld [vmem:[%s402_s0 + $0x28] sm:$0xff] }
   0x8   :  { %v94_v11 = vsel %vm74_vm0, %v37_v10, 0  ;;  %v35_v19 = vpack.c.bf16 %v23_v17, %v22_v16  ;;  %61 = vperm.xlu0 %255, %v50_v18   ;;  %v20_v22 = vld [vmem:[%s402_s0 + $0x20] sm:$0xff]  ;;  %v51_v24 = vld [vmem:[%s404_s2 + $0x8] sm:$0xff]  ;;  %v18_v27 = vld [vmem:[%s402_s0 + $0x10] sm:$0xff] }
   0x9   :  { %v91_v15 = vsel %vm74_vm0, %v36_v14, 0  ;;  %v34_v25 = vpack.c.bf16 %v21_v23, %v20_v22  ;;  %v19_v28 = vld [vmem:[%s402_s0 + $0x18] sm:$0xff]  ;;  %v238_v29 = vld [vmem:[%s404_s2 + $0x30] sm:$0xff]  ;;  %v16_v32 = vld [vmem:[%s402_s0] sm:$0xff] }
   0xa   :  { %v88_v21 = vsel %vm74_vm0, %v35_v19, 0  ;;  %v33_v30 = vpack.c.bf16 %v19_v28, %v18_v27  ;;  %v17_v33 = vld [vmem:[%s402_s0 + $0x8] sm:$0xff]  ;;  %v251_v36 = vld [vmem:[%s403_s1] sm:$0xff]  ;;  %v235_v37 = vld [vmem:[%s404_s2 + $0x10] sm:$0xff] }
   0xb   :  { %v85_v26 = vsel %vm74_vm0, %v34_v25, 0  ;;  %v32_v34 = vpack.c.bf16 %v17_v33, %v16_v32  ;;  %121 = vperm.xlu1 %256, %v235_v37   ;;  %v236_v38 = vld [vmem:[%s404_s2 + $0x18] sm:$0xff]  ;;  %v252_v48 = vld [vmem:[%s403_s1 + $0x8] sm:$0xff]  ;;  %v237_v49 = vld [vmem:[%s404_s2 + $0x20] sm:$0xff] }
   0xc   :  { %v82_v31 = vsel %vm74_vm0, %v33_v30, 0  ;;  %157 = vperm.xlu2 %257, %v237_v49   ;;  %v234_v50 = vld [vmem:[%s403_s1 + $0x18] sm:$0xf]  ;;  %v233_v61 = vld [vmem:[%s403_s1 + $0x10] sm:$0xf]  ;;  %s289_s1 = smov [#allocation2]  }
   0xd   :  { %103 = vmatpush.bf16.xpose.msra.mxu0 %v97_v7  ;;  %v79_v35 = vsel %vm74_vm0, %v32_v34, 0  ;;  %v49_v51 = vunpack.c.l.bf16 %v234_v50  ;;  %s220_s2 = sshll.u32 %s289_s1, 4  ;;  %s221_s2 = int_to_ptr.vmem [resolvable:$true] %s220_s2 }
  0x10   :  { %66 = vperm.xlu0 %255, %v51_v24  }
  0x13   :  { %126 = vperm.xlu1 %256, %v236_v38  }
  0x14   :  { %179 = vperm.xlu2 %257, %v49_v51  }
  0x15   :  { %104 = vmatpush.bf16.xpose.msra.mxu0 %v94_v11 }
  0x18   :  { %191 = vperm.xlu0 %255, %v238_v29  }
  0x1d   :  { %105 = vmatpush.bf16.xpose.msra.mxu0 %v91_v15 }
  0x25   :  { %106 = vmatpush.bf16.xpose.msra.mxu0 %v88_v21 }
  0x2d   :  { %107 = vmatpush.bf16.xpose.msra.mxu0 %v85_v26 }
  0x35   :  { %108 = vmatpush.bf16.xpose.msra.mxu0 %v82_v31 }
  0x3d   :  { %109 = vmatpush.bf16.xpose.msra.mxu0 %v79_v35 }
  0x44   :  { %243 = vmatmul.msk.bf16.vlgmr.msra.gmra.mxu0 %vm74_vm0, %v251_v36 }
  0x66   :  { %v158_v62 = vpop.permute.xlu2 %157 }
  0x6e   :  { %v180_v2 = vpop.permute.xlu2 %179 }
  0x7a   :  { %v62_v39 = vpop.permute.xlu0 %61 }
  0x7d   :  { %v122_v52 = vpop.permute.xlu1 %121 }
  0x82   :  { %v67_v42 = vpop.permute.xlu0 %66 }
  0x85   :  { %v127_v55 = vpop.permute.xlu1 %126 }
  0x8a   :  { %v192_v11 = vpop.permute.xlu0 %191 }
  0xc1   :  { %v111_v40 = vpop.f32.mrf.mxu0 }
  0xc2   :  { %v112_v41 = vadd.f32 %v111_v40, %v62_v39 }
  0xc4   :  { %v116_v45 = vmax.f32 %v112_v41, 0.0 }
  0xc9   :  { %v113_v43 = vpop.f32.mrf.mxu0 }
  0xca   :  { %v114_v44 = vadd.f32 %v113_v43, %v67_v42 }
  0xcc   :  { %v117_v46 = vmax.f32 %v114_v44, 0.0 }
  0xce   :  { %v118_v47 = vpack.c.bf16 %v117_v46, %v116_v45 }
  0xd0   :  { %145 = vmatpush.bf16.msra.mxu1 %v118_v47 }
  0xd3   :  { %248 = vmatmul.msk.bf16.vlgmr.msra.gmra.mxu1 %vm134_vm1, %v252_v48 }
 0x150   :  { %v147_v53 = vpop.f32.mrf.mxu1 }
 0x151   :  { %v148_v54 = vadd.f32 %v147_v53, %v122_v52 }
 0x153   :  { %v152_v58 = vmax.f32 %v148_v54, 0.0 }
 0x158   :  { %v149_v56 = vpop.f32.mrf.mxu1 }
 0x159   :  { %v150_v57 = vadd.f32 %v149_v56, %v127_v55 }
 0x15b   :  { %v153_v59 = vmax.f32 %v150_v57, 0.0 }
 0x15d   :  { %v154_v60 = vpack.c.bf16 %v153_v59, %v152_v58 }
 0x15f   :  { %170 = vmatpush.bf16.msra.mxu2 %v154_v60 }
 0x162   :  { %249 = vmatmul.msk.bf16.vlgmr.msra.gmra.mxu2 %vm134_vm1, %v233_v61 }
 0x1e5   :  { %v172_v63 = vpop.f32.mrf.mxu2 }
 0x1e6   :  { %v173_v0 = vadd.f32 %v172_v63, %v158_v62 }
 0x1e8   :  { %v176_v1 = vmax.f32 %v173_v0, 0.0 }
 0x1ea   :  { %v182_v3 = vmul.f32 %v180_v2, %v176_v1 }
 0x1ec   :  { %v183_v4 = vrot.slane %v182_v3, 4 }
 0x1ed   :  { %v174_v5 = vpop.f32.mrf.mxu2 }
 0x1ee   :  { %v184_v6 = vadd.f32 %v183_v4, %v182_v3 }
 0x1f0   :  { %v185_v7 = vrot.slane %v184_v6, 2 }
 0x1f2   :  { %v186_v8 = vadd.f32 %v185_v7, %v184_v6 }
 0x1f4   :  { %v187_v9 = vrot.slane %v186_v8, 1 }
 0x1f6   :  { %v188_v10 = vadd.f32 %v187_v9, %v186_v8 }
 0x1f8   :  { %v194_v12 = vadd.f32 %v192_v11, %v188_v10 }
 0x1fa   :  { %v250_v13 = vmul.f32 -1.442695, %v194_v12 }
 0x1fc   :  { %258 = vpow2.f32 %v250_v13 }
 0x202   :  { %v259_v14 = vpop.eup %258 }
 0x203   :  { %v198_v15 = vadd.f32 1.0, %v259_v14 }
 0x205   :  { %260 = vrcp.f32 %v198_v15  ;;  %v210_v19 = vand.u32 2147483648, %v198_v15  ;;  %v208_v21 = vand.u32 2147483647, %v198_v15  ;;  %vm204_vm3 = vweird.f32 %v198_v15 }
 0x207   :  { %v211_v23 = vor.u32 1.1754944e-38, %v210_v19  ;;  %vm209_vm5 = vcmp.eq.f32.partialorder %v208_v21, 8.507059e+37 }
 0x20b   :  { %v261_v16 = vpop.eup %260 }
 0x20c   :  { %v200_v17 = vmul.f32 %v261_v16, %v198_v15  ;;  %vm205_vm2 = vweird.f32 %v261_v16 }
 0x20d   :  { %vm206_vm4 = vmor %vm204_vm3, %vm205_vm2 }
 0x20e   :  { %v201_v18 = vsub.f32 1.0, %v200_v17 }
 0x210   :  { %v202_v20 = vmul.f32 %v261_v16, %v201_v18 }
 0x212   :  { %v203_v22 = vadd.f32 %v261_v16, %v202_v20 }
 0x214   :  { %v207_v24 = vsel %vm206_vm4, %v261_v16, %v203_v22 }
 0x215   :  { %v212_v25 = vsel %vm209_vm5, %v211_v23, %v207_v24 }
 0x216   :  { %214 = vst [vmem:[#allocation2] sm:$0x1] %v212_v25 }
 0x217   :  { %225 = dma.vmem_to_hbm [thread:$0]  %s221_s2, 16, %s223_s11, [#allocation3]  }
 0x218   :  { %286 = dma.done.wait [#allocation3], 16  }
 0x219   :  { %287 = vsyncadd [#allocation3], 4294967280 }
 0x21a   :  { %230 = vsyncpa [#allocation3], 1 }

</bundles_post_ra>
